<compile_context>
chip_gen: v6e
topology: v6e:2x2x1
jax: 0.10.0
libtpu: 0.0.40
codegen_flags: <defaults>
</compile_context>

<pallas_src>
import jax
import jax.numpy as jnp
from jax import lax
from jax.experimental import pallas as pl
from jax.experimental.pallas import tpu as pltpu


def _round_up(x, m):
    return ((x + m - 1) // m) * m


def _patch_proj_kernel(x_ref, w_ref, b_ref, o_ref):
    # x_ref: (TM, K) bf16  — streamed over M (Pallas double-buffers the DMA)
    # w_ref: (K, E)  bf16  — resident across the grid
    # b_ref: (1, E)  f32   — resident
    # o_ref: (TM, E) f32
    acc = jnp.dot(x_ref[...], w_ref[...], preferred_element_type=jnp.float32)
    o_ref[...] = (acc + b_ref[...]).astype(o_ref.dtype)


def patch_proj(patches, weight_t, bias2d, *, tile_m=8192):
    """patches: (M, K) bf16, weight_t: (K, E) bf16, bias2d: (1, E) f32 -> (M, E) f32.

    Tiled over M only; K and E stay unpadded (the kernel is HBM-bound, so we never
    trade HBM bytes for MXU utilization).  Row tile is chosen as large as the VMEM
    budget allows, with >= 2 grid steps so v7x's two TensorCores both get work.
    """
    M, K = patches.shape
    Kw, E = weight_t.shape
    assert K == Kw, (K, Kw)

    # Budget: double-buffered (TM,K) bf16 input + (TM,E) f32 output <= ~24 MiB.
    bytes_per_row = K * patches.dtype.itemsize + E * 4
    vmem_cap_tm = max(8, (12 * 1024 * 1024 // bytes_per_row) // 8 * 8)

    M8 = _round_up(M, 8)
    TM = min(tile_m, M8, vmem_cap_tm)
    if TM >= M8 and M8 >= 16:
        # Keep grid_m >= 2 (and balanced) so the "parallel" M axis splits across
        # both TensorCores on v7x; harmless on v5e/v6e.
        TM = _round_up(M8 // 2, 8)
    Mp = _round_up(M, TM)
    grid_m = Mp // TM

    if Mp != M:
        # Zero-pad only the ragged last row-tile (rows are sliced off below).
        patches = jnp.pad(patches, ((0, Mp - M), (0, 0)))

    cost = pl.CostEstimate(
        flops=2 * Mp * K * E,
        bytes_accessed=(Mp * K * patches.dtype.itemsize
                        + K * E * weight_t.dtype.itemsize
                        + Mp * E * 4 + E * 4),
        transcendentals=0,
    )

    out = pl.pallas_call(
        _patch_proj_kernel,
        out_shape=jax.ShapeDtypeStruct((Mp, E), jnp.float32),
        grid_spec=pltpu.PrefetchScalarGridSpec(
            num_scalar_prefetch=0,
            grid=(grid_m,),
            in_specs=[
                pl.BlockSpec((TM, K), lambda i: (i, 0)),   # streamed, unpadded K
                pl.BlockSpec((K, E), lambda i: (0, 0)),    # resident weight
                pl.BlockSpec((1, E), lambda i: (0, 0)),    # resident bias
            ],
            out_specs=pl.BlockSpec((TM, E), lambda i: (i, 0)),  # unpadded E
        ),
        compiler_params=pltpu.CompilerParams(
            dimension_semantics=("parallel",),    # shard M-tiles across TCs on v7x
            vmem_limit_bytes=32 * 1024 * 1024,    # explicit for v5e (16 MiB default)
        ),
        cost_estimate=cost,
    )(patches, weight_t, bias2d)

    if Mp != M:
        out = out[:M]
    return out


class PatchEmbed:
    """JAX/Pallas equivalent of the PyTorch PatchEmbed module."""

    def __init__(self, img_size=(16, 16), patch_size=4, in_chans=4, embed_dim=32,
                 tile_m=8192, key=jax.random.PRNGKey(0)):
        self.img_size = img_size
        self.patch_size = (patch_size, patch_size)
        self.num_patches = (img_size[1] // patch_size) * (img_size[0] // patch_size)
        self.in_chans = in_chans
        self.embed_dim = embed_dim
        self.tile_m = tile_m

        kw_, kb = jax.random.split(key)
        # Deterministic synthetic params; PyTorch Conv2d weight shape: (E, C, ph, pw)
        fan_in = in_chans * patch_size * patch_size
        bound = 1.0 / (fan_in ** 0.5)
        self.weight = jax.random.uniform(
            kw_, (embed_dim, in_chans, patch_size, patch_size),
            minval=-bound, maxval=bound, dtype=jnp.float32)
        self.bias = jax.random.uniform(
            kb, (embed_dim,), minval=-bound, maxval=bound, dtype=jnp.float32)

        # Hoisted per-call prep (perf review): Conv2d weight (E,C,ph,pw) -> (K,E) bf16,
        # bias -> (1,E) f32, computed once here instead of every forward.
        K = in_chans * patch_size * patch_size
        self.weight_t = self.weight.reshape(embed_dim, K).T.astype(jnp.bfloat16)
        self.bias2d = self.bias.reshape(1, embed_dim).astype(jnp.float32)

        self._fwd = jax.jit(self._forward)

    def _forward(self, x):
        B, C, T, H, W = x.shape
        ph, pw = self.patch_size
        Hp, Wp = H // ph, W // pw
        E = self.embed_dim

        # Single fused rearrange + bf16 cast (fused by XLA under jit): rows ordered
        # (b, t, hp, wp), features ordered (c, kh, kw) = Conv2d weight flattening.
        xb = x.astype(jnp.bfloat16)
        p = xb.reshape(B, C, T, Hp, ph, Wp, pw)
        p = jnp.transpose(p, (0, 2, 3, 5, 1, 4, 6))          # (B,T,Hp,Wp,C,ph,pw)
        p = p.reshape(B * T * Hp * Wp, C * ph * pw)           # (M, K)
        # TODO(synk): fold this gather + cast into the kernel (per-frame f32 block,
        # on-chip shuffle) so x is read from HBM exactly once; kept in XLA because
        # the W -> (Wp, pw) lane-split transpose is not reliably lowerable by Mosaic
        # at these small, sub-(8,128) patch sizes.

        out = patch_proj(p, self.weight_t, self.bias2d, tile_m=self.tile_m)  # (M, E)
        return out.reshape(B * T, Hp * Wp, E)

    def __call__(self, x):
        # x: (B, C, T, H, W)
        _, _, T, _, W = x.shape
        out = self._fwd(x)
        return out, T, W // self.patch_size[1]


if __name__ == "__main__":
    # Small shapes consistent with the module: B=2, C=4, T=2, H=W=16, patch=4, embed=32
    B, C, T, H, W = 2, 4, 2, 16, 16
    patch, embed = 4, 32

    key = jax.random.PRNGKey(0)
    kx, kp = jax.random.split(key)
    x = jax.random.normal(kx, (B, C, T, H, W), dtype=jnp.float32)

    mod = PatchEmbed(img_size=(H, W), patch_size=patch, in_chans=C,
                     embed_dim=embed, key=kp)
    out, t_out, w_out = mod(x)
    out = jax.block_until_ready(out)

    Hp, Wp = H // patch, W // patch
    assert out.shape == (B * T, Hp * Wp, embed), out.shape
    assert t_out == T and w_out == Wp

    xf = jnp.transpose(x, (0, 2, 1, 3, 4)).reshape(B * T, C, H, W)

    # Tight check: reference with the same bf16-rounded operands (isolates kernel
    # correctness from the deliberate bf16 cast; only accumulation order differs).
    xf_bf = xf.astype(jnp.bfloat16).astype(jnp.float32)
    w_bf = mod.weight.astype(jnp.bfloat16).astype(jnp.float32)
    ref_bf = lax.conv_general_dilated(
        xf_bf, w_bf, window_strides=(patch, patch), padding="VALID",
        dimension_numbers=("NCHW", "OIHW", "NCHW"),
        precision=lax.Precision.HIGHEST)
    ref_bf = ref_bf + mod.bias.reshape(1, embed, 1, 1)
    ref_bf = ref_bf.reshape(B * T, embed, -1).transpose(0, 2, 1)
    assert jnp.allclose(out, ref_bf, atol=1e-4, rtol=1e-4), \
        float(jnp.max(jnp.abs(out - ref_bf)))

    # Loose check: full-f32 PyTorch-equivalent conv (bounds the bf16 rounding).
    ref = lax.conv_general_dilated(
        xf, mod.weight, window_strides=(patch, patch), padding="VALID",
        dimension_numbers=("NCHW", "OIHW", "NCHW"),
        precision=lax.Precision.HIGHEST)
    ref = ref + mod.bias.reshape(1, embed, 1, 1)
    ref = ref.reshape(B * T, embed, -1).transpose(0, 2, 1)
    assert jnp.allclose(out, ref, atol=3e-2, rtol=3e-2), \
        float(jnp.max(jnp.abs(out - ref)))

    print("KERNEL_OK")
</pallas_src>

<mosaic_0001>
module attributes {stable_mosaic.version = 11 : i64} {
  func.func @_patch_proj_kernel(%arg0: i32, %arg1: memref<32x64xbf16, #tpu.memory_space<vmem>>, %arg2: memref<64x32xbf16, #tpu.memory_space<vmem>>, %arg3: memref<1x32xf32, #tpu.memory_space<vmem>>, %arg4: memref<32x32xf32, #tpu.memory_space<vmem>>) attributes {dimension_semantics = [#tpu.dimension_semantics<parallel>], iteration_bounds = array<i64: 2>, scalar_prefetch = 0 : i64, scratch_operands = 0 : i64, tpu.core_type = #tpu.core_type<tc>, window_params = [{transform_indices = @transform_0, window_bounds = array<i64: 32, 64>}, {pipeline_mode = #tpu.pipeline_mode<synchronous>, transform_indices = @transform_1, window_bounds = array<i64: 64, 32>}, {pipeline_mode = #tpu.pipeline_mode<synchronous>, transform_indices = @transform_2, window_bounds = array<i64: 1, 32>}, {transform_indices = @transform_3, window_bounds = array<i64: 32, 32>}]} {
    %c0 = arith.constant 0 : index
    %c0_0 = arith.constant 0 : index
    %0 = vector.load %arg1[%c0, %c0_0] : memref<32x64xbf16, #tpu.memory_space<vmem>>, vector<32x64xbf16>
    %c0_1 = arith.constant 0 : index
    %c0_2 = arith.constant 0 : index
    %1 = vector.load %arg2[%c0_1, %c0_2] : memref<64x32xbf16, #tpu.memory_space<vmem>>, vector<64x32xbf16>
    %cst = arith.constant dense<0.000000e+00> : vector<32x32xf32>
    %2 = tpu.matmul %0, %1, %cst {dimension_numbers = #tpu.dot_dimension_numbers<[1], [0], [0], [1], [0, 0, 1, 1], [], []>} : vector<32x64xbf16>, vector<64x32xbf16>, vector<32x32xf32> -> vector<32x32xf32>
    %c0_3 = arith.constant 0 : index
    %c0_4 = arith.constant 0 : index
    %3 = vector.load %arg3[%c0_3, %c0_4] : memref<1x32xf32, #tpu.memory_space<vmem>>, vector<1x32xf32>
    %4 = vector.broadcast %3 : vector<1x32xf32> to vector<32x32xf32>
    %5 = arith.addf %2, %4 : vector<32x32xf32>
    %c0_5 = arith.constant 0 : index
    %c0_6 = arith.constant 0 : index
    %6 = vector.load %arg4[%c0_5, %c0_6] : memref<32x32xf32, #tpu.memory_space<vmem>>, vector<32x32xf32>
    tpu.vector_store %arg4[%c0_5, %c0_6], %5 {strides = array<i32>} : memref<32x32xf32, #tpu.memory_space<vmem>>, vector<32x32xf32>,
    return
  }
  func.func @transform_0(%arg0: i32) -> (i32, i32) {
    %c0_i32 = arith.constant 0 : i32
    %c0_i32_0 = arith.constant 0 : i32
    return %arg0, %c0_i32 : i32, i32
  }
  func.func @transform_1(%arg0: i32) -> (i32, i32) {
    %c0_i32 = arith.constant 0 : i32
    %c0_i32_0 = arith.constant 0 : i32
    %c0_i32_1 = arith.constant 0 : i32
    return %c0_i32, %c0_i32_0 : i32, i32
  }
  func.func @transform_2(%arg0: i32) -> (i32, i32) {
    %c0_i32 = arith.constant 0 : i32
    %c0_i32_0 = arith.constant 0 : i32
    %c0_i32_1 = arith.constant 0 : i32
    return %c0_i32, %c0_i32_0 : i32, i32
  }
  func.func @transform_3(%arg0: i32) -> (i32, i32) {
    %c0_i32 = arith.constant 0 : i32
    %c0_i32_0 = arith.constant 0 : i32
    return %arg0, %c0_i32 : i32, i32
  }
}

</mosaic_0001>

<bundles_post_ra>
// kernel: _forward.1
= control target key start
LH: loop header
LB: loop body
LE: loop exit
PB: predicated region body
PF: predicated region fallthrough
CT: control target
= control target key end

     0   :  { %8 = vsyncpa [#allocation3], 0  ;;  %s655_s0 = inlined_call_operand.vmem [shape: bf16[64,64], index: 0, kind: input, shape index: {}]   ;;  %s656_s1 = inlined_call_operand.vmem [shape: bf16[64,32], index: 1, kind: input, shape index: {}]   ;;  %s657_s2 = inlined_call_operand.vmem [shape: f32[1,32], index: 2, kind: input, shape index: {}]   ;;  %s658_s3 = inlined_call_operand.hbm [shape: f32[64,32], index: 3, kind: output, shape index: {}]  }
   0x1   :  { %10 = vsyncpa [#allocation3 + $0x1], 0  ;;  %s535_s12 = smov 0   ;;  %s537_s13 = smov 0  }
   0x2   :  { %s539_s14 = smov 0   ;;  %s541_s15 = smov 0  }
   0x3 LB: > { %s556_s16 = sadd.s32 4294967295, %s510_s15   ;;  %s363_s17 = sadd.s32 4294967294, %s510_s15   ;;  %s510_s15 = sphi %s541_s15, %s664_s15   ;;  %s506_s14 = sphi %s539_s14, %s663_s14   ;;  %s502_s13 = sphi %s537_s13, %s662_s13   ;;  %s498_s12 = sphi %s535_s12, %s661_s12  }
   0x4   : > { %s560_s18 = sadd.s32 1, %s510_s15   ;;  %s91_s19 = sadd.s32 1, %s506_s14 }
   0x5   : > { %s88_s20 = ssub.s32 %s510_s15, %s560_s18  ;;  %p101_p0 = scmp.ne.s32.totalorder %s506_s14, %s502_s13 }
   0x6   : > { %p89_p1 = scmp.eq.s32.totalorder %s88_s20, 0  ;;  %p102_p2 = scmp.eq.s32.totalorder %s556_s16, 1 }
   0x7   : > { %p107_p3 = scmp.ne.s32.totalorder %s502_s13, %s498_s12  ;;  %p108_p4 = scmp.eq.s32.totalorder %s363_s17, 1 }
   0x8   : > { %s571_s21 = scalar_select %p89_p1, %s506_s14, %s91_s19  }
   0x9   : > { %p573_p5 = por %p102_p2, %p101_p0  ;;  %p577_p6 = por %p108_p4, %p107_p3 }
   0xa   : > { %p366_p7 = scmp.ge.s32.totalorder %s510_s15, 1  ;;  %p141_p8 = scmp.lt.s32.totalorder %s510_s15, 3 }
   0xc   : > { %p142_p9 = pnand %p366_p7, %p141_p8 }
   0xd   : > { %s368_s26 = sshll.u32 (!%p142_p9), %s556_s16, 2  ;;  %s162_s10 = sand.u32 (!%p142_p9), 1, %s502_s13  }
   0xe   : > { %145 = sbr.rel (%p142_p9) target bundleno = 251 (0xfb), region = 32  ;;  %p166_p10 = scmp.lt.s32.totalorder (!%p142_p9), %s368_s26, 7 }
   0xf   : > { %s367_s11 = sshll.u32 (!%p142_p9), %s162_s10, 5  ;;  %s384_s25 = sshll.u32 (!%p142_p9), %s556_s16, 9 }
  0x10   : > { %s164_s20 = scalar_lea.vmem (!%p142_p9), [#allocation2], %s367_s11  ;;  %s611_s28 = scalar_lea.hbm (!%p142_p9), %s658_s3, %s384_s25 }
  0x11   : > { %s301_s24 = sshll.u32 (!%p142_p9), %s164_s20, 4  ;;  %s615_s16 = scalar_lea.sflag (!%p142_p9), [#allocation3], %s162_s10  ;;  %s606_s24 = int_to_ptr.vmem [resolvable:$true] %s301_s24 }
  0x12   : > { %s450_s29 = scalar_lea.vmem (!%p142_p9), %s606_s24, 512  ;;  %s512_s30 = smov (!%p142_p9), [#allocation2]  }
  0x13   : > { %v444_v0 = vld [vmem:[%s656_s1 + $0x18] sm:$0xff]   ;;  %v445_v1 = vld [vmem:[%s656_s1 + $0x10] sm:$0xff]   ;;  %s666_s26 = smov (!%p166_p10, %s368_s26), 7  ;;  %v446_v2 = vld [vmem:[%s656_s1 + $0x8] sm:$0xff]   ;;  %vm226_vm0 = vcmask 523264   ;;  %vm282_vm1 = vcmask 261120   ;;  %p451_p11 = scmp.ne.s32.totalorder %s606_s24, %s450_s29 }
  0x14   : > { %391 = vmatprep.subr.bf16.mxu0 %v444_v0  ;;  %s369_s4 = sshll.u32 %s666_s26, 2  ;;  %v447_v4 = vld [vmem:[%s656_s1] sm:$0xff]  }
  0x15   : > { %392 = vmatpush3.bf16.msra.mxu0 %v444_v0  ;;  %s169_s7 = scalar_lea.vmem %s655_s0, %s369_s4  ;;  %v370_v6 = vld [vmem:[%s657_s2] ss:$0 sm:$0xff]  ;;  %p452_p12 = pnand %p451_p11, %p573_p5 }
  0x16   : > { %393 = vmatprep.subr.bf16.mxu0 %v445_v1  ;;  %v448_v3 = vld [vmem:[%s169_s7] sm:$0xff]   ;;  %v449_v5 = vld [vmem:[%s169_s7 + $0x8] sm:$0xff]   ;;  %s454_s4 = sshll.u32 %s512_s30, 4  ;;  %s455_s4 = int_to_ptr.vmem [resolvable:$false] %s454_s4 }
  0x17   : > { %399 = vmatprep.mubr.msk.bf16.mxu0 %vm226_vm0, %v448_v3  ;;  %p453_p13 = pneg %p452_p12  ;;  %s456_s5 = scalar_lea.vmem %s455_s4, 1024 }
  0x18   : > { %p457_p0 = scmp.lt.s32.totalorder %s606_s24, %s455_s4  ;;  %p458_p1 = scmp.lt.s32.totalorder %s456_s5, %s450_s29 }
  0x19   : > { %394 = vmatpush3.bf16.msra.mxu0 %v445_v1 }
  0x1a   : > { %395 = vmatprep.subr.bf16.mxu0 %v446_v2  ;;  %p459_p2 = por %p458_p1, %p457_p0 }
  0x1c   : > { %p460_p3 = pnand %p459_p2, %p453_p13 }
  0x1d   : > { %396 = vmatpush3.bf16.msra.mxu0 %v446_v2 }
  0x1e   : > { %397 = vmatprep.subr.bf16.mxu0 %v447_v4 }
  0x21   : > { %398 = vmatpush3.bf16.msra.mxu0 %v447_v4 }
  0x24   : > { %400 = vmatmul.mubr.msk.bf16.vlgmr.msra.gmra.mxu0 %vm226_vm0, %v449_v5 }
  0xe4   : > { %v401_v7 = vpop.f32.mrf.mxu0 }
  0xe5   : > { %v276_v8 = vadd.f32 %v401_v7, %v370_v6 }
  0xe6   : > { %v267_v9 = vpop.f32.mrf.mxu0 }
  0xe7   : > { %285 = vst.msk [vmem:[%s164_s20 + $0x10] sm:$0xff] %vm282_vm1, %v276_v8  ;;  %v268_v10 = vadd.f32 %v370_v6, %v267_v9 }
  0xe8   : > { %v402_v11 = vpop.f32.mrf.mxu0 }
  0xe9   : > { %283 = vst.msk [vmem:[%s164_s20] sm:$0xff] %vm282_vm1, %v268_v10  ;;  %v279_v12 = vadd.f32 %v402_v11, %v370_v6 }
  0xea   : > { %v270_v13 = vpop.f32.mrf.mxu0 }
  0xeb   : > { %286 = vst.msk [vmem:[%s164_s20 + $0x18] sm:$0xff] %vm282_vm1, %v279_v12  ;;  %v271_v14 = vadd.f32 %v370_v6, %v270_v13 }
  0xed   : > { %284 = vst.msk [vmem:[%s164_s20 + $0x8] sm:$0xff] %vm282_vm1, %v271_v14 }
  0xee   : > { %463 = shalt.err (!%p460_p3)
}
  0xef   : > { %s464_s6 = scalar_lea.hbm %s611_s28, 512  ;;  %s468_s9 = scalar_lea.hbm %s658_s3, 1024 }
  0xf0   : > { %p465_p4 = scmp.ne.s32.totalorder %s611_s28, %s464_s6  ;;  %p469_p9 = scmp.lt.s32.totalorder %s611_s28, %s658_s3 }
  0xf1   : > { %p470_p10 = scmp.lt.s32.totalorder %s468_s9, %s464_s6 }
  0xf2   : > { %p466_p7 = pnand %p465_p4, %p573_p5 }
  0xf3   : > { %p471_p11 = por %p470_p10, %p469_p9 }
  0xf4   : > { %p467_p8 = pneg %p466_p7 }
  0xf6   : > { %p472_p12 = pnand %p471_p11, %p467_p8 }
  0xf8   : > { %475 = shalt.err (!%p472_p12)
}
  0xf9   : > { %s513_s17 = smov 128   ;;  %s514_s19 = smov 8  }
  0xfa   : > { %403 = dma.vmem_to_hbm [thread:$0]  (%p573_p5), %s606_s24, 512, %s611_s28, %s615_s16, %s513_s17, %s513_s17, %s514_s19  }
  0xfb PF: > { %p409_p13 = scmp.ge.s32.totalorder %s510_s15, 2  ;;  %s316_s20 = sand.u32 1, %s498_s12  }
  0xfc   : > { %s317_s25 = scalar_lea.sflag [#allocation3], %s316_s20 }
  0xfd   : > { %p406_p0 = pnand %p409_p13, %p577_p6 }
  0xff   : > { %p407_p1 = pneg %p406_p0 }
 0x101   : > { %493 = dma.done.wait (%p407_p1), %s317_s25, 512  }
 0x102   : > { %495 = vsyncadd (%p407_p1), %s317_s25, 4294966784  ;;  %p13_p2 = scmp.ge.s32.totalorder %s560_s18, 4   ;;  %s661_s12 = smov %s502_s13 }
 0x103   : > { %s662_s13 = smov %s506_s14  ;;  %s663_s14 = smov %s571_s21 }
 0x104   : > { %s664_s15 = smov %s560_s18  ;;  %15 = sbr.rel (!%p13_p2) target bundleno = 3 (0x3), region = 67 }
 0x109   :  { %322 = vsyncpa [#allocation3], 1 }
 0x10a   :  { %324 = vsyncpa [#allocation3 + $0x1], 1 }

</bundles_post_ra>
